<compile_context>
chip_gen: v7x
topology: tpu7x:2x2x1
jax: 0.10.0
libtpu: 0.0.40
codegen_flags: <defaults>
</compile_context>

<pallas_src>
import functools

import numpy as np
import jax
import jax.numpy as jnp
from jax.experimental import pallas as pl
from jax.experimental.pallas import tpu as pltpu


# ----------------------------------------------------------------------------
# Activations
# ----------------------------------------------------------------------------
def _apply_act(x, name):
    if name == "relu":
        return jnp.maximum(x, 0.0)
    if name == "tanh":
        return jnp.tanh(x)
    if name in ("none", "identity", None):
        return x
    raise ValueError(f"unknown activation {name}")


# ----------------------------------------------------------------------------
# Static operator construction (numpy, done once at parameter-prep time)
# ----------------------------------------------------------------------------
def _interp_matrix_np(n_in, n_out):
    """1-D linear interpolation matrix, align_corners=True (PyTorch Upsample)."""
    if n_in == 1:
        return np.ones((n_out, 1), np.float64)
    src = np.arange(n_out, dtype=np.float64) * (n_in - 1) / (n_out - 1)
    lo = np.clip(np.floor(src).astype(np.int64), 0, n_in - 2)
    frac = src - lo
    A = np.zeros((n_out, n_in), np.float64)
    A[np.arange(n_out), lo] += 1.0 - frac
    A[np.arange(n_out), lo + 1] += frac
    return A


def prepare_decoder_params(params, cfg):
    """Pre-transform all weights into the static operators the fused kernel uses."""
    C0, H0, W0 = cfg["state_dim_after_mlp"]
    latent = cfg["latent_state_dim"]
    n = len(cfg["kernel_sizes"])

    # --- Linear(latent -> C0*H0*W0), re-ordered so the kernel produces the
    #     (rows=H0, lanes=W0*C0) layout directly. PyTorch view(-1,C0,H0,W0) is
    #     row-major (c, h, w), i.e. out index = c*H0*W0 + h*W0 + w. ---
    fc_w = np.asarray(params["fc_w"], np.float64)            # (C0*H0*W0, latent)
    fc_b = np.asarray(params["fc_b"], np.float64)            # (C0*H0*W0,)
    fc_w_r = fc_w.reshape(C0, H0, W0, latent)                # (c, h, w, l)
    fc3_w = np.transpose(fc_w_r, (1, 3, 2, 0)).reshape(H0, latent, W0 * C0)
    fc3_b = np.transpose(fc_b.reshape(C0, H0, W0), (1, 2, 0)).reshape(H0, W0 * C0)

    layer_arrays = []
    ks = []
    H, W, C = H0, W0, C0
    for i in range(n):
        k = int(cfg["kernel_sizes"][i])
        s = int(cfg["upsampling_factors"][i])
        Cout = int(cfg["channels"][i + 1])
        assert C == int(cfg["channels"][i]), "channel bookkeeping mismatch"
        if k % 2 != 1:
            # getSamePadding requires (k-1) divisible by 2 for stride 1
            raise ValueError("kernel size must be odd for 'same' padding with stride 1")
        Ho, Wo = H * s, W * s
        p = (k - 1) // 2                                      # getSamePadding, stride 1

        Aw = _interp_matrix_np(W, Wo)                         # (Wo, W)
        Ah = _interp_matrix_np(H, Ho)                         # (Ho, H)

        # Kpad: W-upsample on the flattened (w*C + c) lanes, plus p*C zero columns
        # on each side (the conv's W zero-padding).  shape (W*C, (Wo+2p)*C)
        kron = np.kron(Aw.T, np.eye(C))                       # (W*C, Wo*C)
        Kpad = np.zeros((W * C, (Wo + 2 * p) * C))
        Kpad[:, p * C:(Wo + p) * C] = kron

        # Ahpad[di]: H-upsample fused with the conv's row tap di (+ H zero-pad).
        # shape (k, Ho, H)
        Ahpad = np.zeros((k, Ho, H))
        for di in range(k):
            for ho in range(Ho):
                src = ho + di - p
                if 0 <= src < Ho:
                    Ahpad[di, ho, :] = Ah[src, :]

        # M[di]: the conv's column taps as a block-Toeplitz matrix acting on the
        # W-padded flattened lanes.  shape (k, (Wo+2p)*C, Wo*Cout)
        w_np = np.asarray(params[f"conv{i}_w"], np.float64)   # (Cout, Cin, k, k)
        b_np = np.asarray(params[f"conv{i}_b"], np.float64)   # (Cout,)
        M = np.zeros((k, (Wo + 2 * p) * C, Wo * Cout))
        for di in range(k):
            for w_out in range(Wo):
                for dj in range(k):
                    wp = w_out + dj
                    # M[di, wp*C + c, w_out*Cout + co] = w_np[co, c, di, dj]
                    M[di, wp * C:(wp + 1) * C,
                      w_out * Cout:(w_out + 1) * Cout] = w_np[:, :, di, dj].T

        bias_row = np.tile(b_np, Wo)[None, :]                 # (1, Wo*Cout)

        layer_arrays += [
            jnp.asarray(Kpad, jnp.float32),
            jnp.asarray(Ahpad, jnp.float32),
            jnp.asarray(M, jnp.float32),
            jnp.asarray(bias_row, jnp.float32),
        ]
        ks.append(k)
        H, W, C = Ho, Wo, Cout

    meta = dict(activation=cfg["activation"],
                activation_output=cfg["activation_output"],
                ks=tuple(ks),
                out_hwc=(H, W, C))
    return dict(fc_w=jnp.asarray(fc3_w, jnp.float32),
                fc_b=jnp.asarray(fc3_b, jnp.float32),
                layer_arrays=layer_arrays,
                meta=meta)


# ----------------------------------------------------------------------------
# Fused Pallas kernel: whole decoder for one batch element per grid step
# ----------------------------------------------------------------------------
def _decoder_kernel(*refs, meta):
    ks = meta["ks"]
    n = len(ks)
    z_ref, fcw_ref, fcb_ref = refs[0], refs[1], refs[2]
    out_ref = refs[3 + 4 * n]
    act_mid = meta["activation"]
    act_out = meta["activation_output"]

    # --- Linear(latent -> C0*H0*W0) + activation, produced directly in
    #     (rows = H0, lanes = W0*C0) layout via per-row weight slices. ---
    z = z_ref[0]                                              # (1, latent)
    H0 = fcw_ref.shape[0]
    rows = [jnp.dot(z, fcw_ref[h], preferred_element_type=jnp.float32)
            for h in range(H0)]
    x = jnp.concatenate(rows, axis=0) + fcb_ref[...]          # (H0, W0*C0)
    x = _apply_act(x, act_mid)

    # --- decoder layers: bilinear upsample + 'same' conv + activation, all fused ---
    for i in range(n):
        kpad_ref, ah_ref, m_ref, bias_ref = refs[3 + 4 * i: 3 + 4 * i + 4]
        k = ks[i]
        # W-direction upsample + W zero-pad (acts on lanes)
        xwp = jnp.dot(x, kpad_ref[...], preferred_element_type=jnp.float32)
        # H-direction upsample fused with the conv row taps (acts on rows);
        # conv column taps folded into the block-Toeplitz matrices M[di].
        acc = None
        for di in range(k):
            t = jnp.dot(ah_ref[di], xwp, preferred_element_type=jnp.float32)
            c = jnp.dot(t, m_ref[di], preferred_element_type=jnp.float32)
            acc = c if acc is None else acc + c
        acc = acc + bias_ref[...]
        x = _apply_act(acc, act_out if i == n - 1 else act_mid)

    out_ref[0] = x                                            # (Hf, Wf*Cf)


def _const_index_map(ndim):
    return lambda b: (0,) * ndim


def conv_mlp_decoder_forward(z, prep):
    """z: (B, latent) -> decoder output, NCHW (B, Cout, Hf, Wf)."""
    meta = prep["meta"]
    Hf, Wf, Cf = meta["out_hwc"]
    B, latent = z.shape
    z3 = z.astype(jnp.float32).reshape(B, 1, latent)

    inputs = [z3, prep["fc_w"], prep["fc_b"]] + list(prep["layer_arrays"])
    in_specs = [pl.BlockSpec((1, 1, latent), lambda b: (b, 0, 0))]
    for arr in inputs[1:]:
        in_specs.append(pl.BlockSpec(arr.shape, _const_index_map(arr.ndim)))
    out_spec = pl.BlockSpec((1, Hf, Wf * Cf), lambda b: (b, 0, 0))

    out = pl.pallas_call(
        functools.partial(_decoder_kernel, meta=meta),
        out_shape=jax.ShapeDtypeStruct((B, Hf, Wf * Cf), jnp.float32),
        grid_spec=pltpu.PrefetchScalarGridSpec(
            num_scalar_prefetch=0,
            grid=(B,),
            in_specs=in_specs,
            out_specs=out_spec,
        ),
        compiler_params=pltpu.CompilerParams(
            dimension_semantics=("parallel",)),
    )(*inputs)

    # Module boundary only: NHWC-flat -> NCHW (tiny, single XLA op).
    return out.reshape(B, Hf, Wf, Cf).transpose(0, 3, 1, 2)


# ----------------------------------------------------------------------------
# Pure-JAX reference (same math, no Pallas) for a self-consistency check
# ----------------------------------------------------------------------------
def reference_forward(z, raw_params, cfg):
    h = _apply_act(z @ raw_params["fc_w"].T + raw_params["fc_b"], cfg["activation"])
    B = z.shape[0]
    C0, H0, W0 = cfg["state_dim_after_mlp"]
    x = h.reshape(B, C0, H0, W0)
    n = len(cfg["kernel_sizes"])
    for i in range(n):
        s = cfg["upsampling_factors"][i]
        _, C, H, W = x.shape
        Ah = jnp.asarray(_interp_matrix_np(H, H * s), jnp.float32)
        Aw = jnp.asarray(_interp_matrix_np(W, W * s), jnp.float32)
        x = jnp.einsum("Hh,bchw,Ww->bcHW", Ah, x, Aw)
        w = raw_params[f"conv{i}_w"]
        b = raw_params[f"conv{i}_b"]
        k = w.shape[2]
        pad = (k - 1) // 2
        x = jax.lax.conv_general_dilated(
            x, w, window_strides=(1, 1), padding=[(pad, pad), (pad, pad)],
            dimension_numbers=("NCHW", "OIHW", "NCHW"))
        x = x + b[None, :, None, None]
        act = cfg["activation_output"] if i == n - 1 else cfg["activation"]
        x = _apply_act(x, act)
    return x


# ----------------------------------------------------------------------------
if __name__ == "__main__":
    # Small config consistent with the module:
    #   decoder: latent 8 -> MLP -> (4, 4, 4) -> [up x2, conv 4->8] -> [up x2, conv 8->1]
    cfg = dict(
        latent_state_dim=8,
        state_dim_after_mlp=(4, 4, 4),
        kernel_sizes=[3, 3],                       # conv_layers_kernel_sizes[::-1]
        channels=[4, 8, 1],                        # reversed encoder channels + input_chanels
        upsampling_factors=[2, 2],
        activation="relu",                         # activations.getActivation(activation)
        activation_output="tanh",                  # activations.getActivation(activation_output)
    )

    key = jax.random.PRNGKey(0)
    keys = jax.random.split(key, 8)
    C0, H0, W0 = cfg["state_dim_after_mlp"]
    out_features = C0 * H0 * W0

    raw_params = {
        "fc_w": 0.1 * jax.random.normal(keys[0], (out_features, cfg["latent_state_dim"]), jnp.float32),
        "fc_b": 0.1 * jax.random.normal(keys[1], (out_features,), jnp.float32),
    }
    for i in range(len(cfg["kernel_sizes"])):
        cin, cout, k = cfg["channels"][i], cfg["channels"][i + 1], cfg["kernel_sizes"][i]
        raw_params[f"conv{i}_w"] = 0.1 * jax.random.normal(keys[2 + 2 * i], (cout, cin, k, k), jnp.float32)
        raw_params[f"conv{i}_b"] = 0.1 * jax.random.normal(keys[3 + 2 * i], (cout,), jnp.float32)

    prep = prepare_decoder_params(raw_params, cfg)

    batch = 2
    z = jax.random.normal(keys[6], (batch, cfg["latent_state_dim"]), jnp.float32)

    fwd = jax.jit(functools.partial(conv_mlp_decoder_forward, prep=prep))
    out = jax.block_until_ready(fwd(z))

    ref = jax.block_until_ready(reference_forward(z, raw_params, cfg))
    assert out.shape == (batch, cfg["channels"][-1], 16, 16), out.shape
    np.testing.assert_allclose(np.asarray(out), np.asarray(ref), rtol=1e-4, atol=1e-4)

    print("KERNEL_OK")
</pallas_src>

<mosaic_0001>
module attributes {stable_mosaic.version = 11 : i64} {
  func.func @_decoder_kernel(%arg0: i32, %arg1: memref<1x1x8xf32, #tpu.memory_space<vmem>>, %arg2: memref<4x8x16xf32, #tpu.memory_space<vmem>>, %arg3: memref<4x16xf32, #tpu.memory_space<vmem>>, %arg4: memref<16x40xf32, #tpu.memory_space<vmem>>, %arg5: memref<3x8x4xf32, #tpu.memory_space<vmem>>, %arg6: memref<3x40x64xf32, #tpu.memory_space<vmem>>, %arg7: memref<1x64xf32, #tpu.memory_space<vmem>>, %arg8: memref<64x144xf32, #tpu.memory_space<vmem>>, %arg9: memref<3x16x8xf32, #tpu.memory_space<vmem>>, %arg10: memref<3x144x16xf32, #tpu.memory_space<vmem>>, %arg11: memref<1x16xf32, #tpu.memory_space<vmem>>, %arg12: memref<1x16x16xf32, #tpu.memory_space<vmem>>) attributes {dimension_semantics = [#tpu.dimension_semantics<parallel>], iteration_bounds = array<i64: 2>, scalar_prefetch = 0 : i64, scratch_operands = 0 : i64, tpu.core_type = #tpu.core_type<tc>, window_params = [{transform_indices = @transform_0, window_bounds = array<i64: 1, 1, 8>}, {pipeline_mode = #tpu.pipeline_mode<synchronous>, transform_indices = @transform_1, window_bounds = array<i64: 4, 8, 16>}, {pipeline_mode = #tpu.pipeline_mode<synchronous>, transform_indices = @transform_2, window_bounds = array<i64: 4, 16>}, {pipeline_mode = #tpu.pipeline_mode<synchronous>, transform_indices = @transform_3, window_bounds = array<i64: 16, 40>}, {pipeline_mode = #tpu.pipeline_mode<synchronous>, transform_indices = @transform_4, window_bounds = array<i64: 3, 8, 4>}, {pipeline_mode = #tpu.pipeline_mode<synchronous>, transform_indices = @transform_5, window_bounds = array<i64: 3, 40, 64>}, {pipeline_mode = #tpu.pipeline_mode<synchronous>, transform_indices = @transform_6, window_bounds = array<i64: 1, 64>}, {pipeline_mode = #tpu.pipeline_mode<synchronous>, transform_indices = @transform_7, window_bounds = array<i64: 64, 144>}, {pipeline_mode = #tpu.pipeline_mode<synchronous>, transform_indices = @transform_8, window_bounds = array<i64: 3, 16, 8>}, {pipeline_mode = #tpu.pipeline_mode<synchronous>, transform_indices = @transform_9, window_bounds = array<i64: 3, 144, 16>}, {pipeline_mode = #tpu.pipeline_mode<synchronous>, transform_indices = @transform_10, window_bounds = array<i64: 1, 16>}, {transform_indices = @transform_11, window_bounds = array<i64: 1, 16, 16>}]} {
    %c0 = arith.constant 0 : index
    %c0_0 = arith.constant 0 : index
    %c0_1 = arith.constant 0 : index
    %0 = vector.load %arg1[%c0, %c0_0, %c0_1] : memref<1x1x8xf32, #tpu.memory_space<vmem>>, vector<1x1x8xf32>
    %1 = vector.shape_cast %0 : vector<1x1x8xf32> to vector<1x8xf32>
    %c0_2 = arith.constant 0 : index
    %c0_3 = arith.constant 0 : index
    %c0_4 = arith.constant 0 : index
    %2 = vector.load %arg2[%c0_2, %c0_3, %c0_4] : memref<4x8x16xf32, #tpu.memory_space<vmem>>, vector<1x8x16xf32>
    %3 = vector.shape_cast %2 : vector<1x8x16xf32> to vector<8x16xf32>
    %cst = arith.constant dense<0.000000e+00> : vector<1x16xf32>
    %4 = tpu.matmul %1, %3, %cst {dimension_numbers = #tpu.dot_dimension_numbers<[1], [0], [0], [1], [0, 0, 1, 1], [], []>} : vector<1x8xf32>, vector<8x16xf32>, vector<1x16xf32> -> vector<1x16xf32>
    %c1 = arith.constant 1 : index
    %c0_5 = arith.constant 0 : index
    %c0_6 = arith.constant 0 : index
    %5 = vector.load %arg2[%c1, %c0_5, %c0_6] : memref<4x8x16xf32, #tpu.memory_space<vmem>>, vector<1x8x16xf32>
    %6 = vector.shape_cast %5 : vector<1x8x16xf32> to vector<8x16xf32>
    %cst_7 = arith.constant dense<0.000000e+00> : vector<1x16xf32>
    %7 = tpu.matmul %1, %6, %cst_7 {dimension_numbers = #tpu.dot_dimension_numbers<[1], [0], [0], [1], [0, 0, 1, 1], [], []>} : vector<1x8xf32>, vector<8x16xf32>, vector<1x16xf32> -> vector<1x16xf32>
    %c2 = arith.constant 2 : index
    %c0_8 = arith.constant 0 : index
    %c0_9 = arith.constant 0 : index
    %8 = vector.load %arg2[%c2, %c0_8, %c0_9] : memref<4x8x16xf32, #tpu.memory_space<vmem>>, vector<1x8x16xf32>
    %9 = vector.shape_cast %8 : vector<1x8x16xf32> to vector<8x16xf32>
    %cst_10 = arith.constant dense<0.000000e+00> : vector<1x16xf32>
    %10 = tpu.matmul %1, %9, %cst_10 {dimension_numbers = #tpu.dot_dimension_numbers<[1], [0], [0], [1], [0, 0, 1, 1], [], []>} : vector<1x8xf32>, vector<8x16xf32>, vector<1x16xf32> -> vector<1x16xf32>
    %c3 = arith.constant 3 : index
    %c0_11 = arith.constant 0 : index
    %c0_12 = arith.constant 0 : index
    %11 = vector.load %arg2[%c3, %c0_11, %c0_12] : memref<4x8x16xf32, #tpu.memory_space<vmem>>, vector<1x8x16xf32>
    %12 = vector.shape_cast %11 : vector<1x8x16xf32> to vector<8x16xf32>
    %cst_13 = arith.constant dense<0.000000e+00> : vector<1x16xf32>
    %13 = tpu.matmul %1, %12, %cst_13 {dimension_numbers = #tpu.dot_dimension_numbers<[1], [0], [0], [1], [0, 0, 1, 1], [], []>} : vector<1x8xf32>, vector<8x16xf32>, vector<1x16xf32> -> vector<1x16xf32>
    %14 = tpu.concatenate %4, %7, %10, %13 in 0 : vector<1x16xf32>, vector<1x16xf32>, vector<1x16xf32>, vector<1x16xf32> -> vector<4x16xf32>
    %c0_14 = arith.constant 0 : index
    %c0_15 = arith.constant 0 : index
    %15 = vector.load %arg3[%c0_14, %c0_15] : memref<4x16xf32, #tpu.memory_space<vmem>>, vector<4x16xf32>
    %16 = arith.addf %14, %15 : vector<4x16xf32>
    %cst_16 = arith.constant 0.000000e+00 : f32
    %17 = vector.broadcast %cst_16 : f32 to vector<4x16xf32>
    %18 = arith.maximumf %16, %17 : vector<4x16xf32>
    %c0_17 = arith.constant 0 : index
    %c0_18 = arith.constant 0 : index
    %19 = vector.load %arg4[%c0_17, %c0_18] : memref<16x40xf32, #tpu.memory_space<vmem>>, vector<16x40xf32>
    %cst_19 = arith.constant dense<0.000000e+00> : vector<4x40xf32>
    %20 = tpu.matmul %18, %19, %cst_19 {dimension_numbers = #tpu.dot_dimension_numbers<[1], [0], [0], [1], [0, 0, 1, 1], [], []>} : vector<4x16xf32>, vector<16x40xf32>, vector<4x40xf32> -> vector<4x40xf32>
    %c0_20 = arith.constant 0 : index
    %c0_21 = arith.constant 0 : index
    %c0_22 = arith.constant 0 : index
    %21 = vector.load %arg5[%c0_20, %c0_21, %c0_22] : memref<3x8x4xf32, #tpu.memory_space<vmem>>, vector<1x8x4xf32>
    %22 = vector.shape_cast %21 : vector<1x8x4xf32> to vector<8x4xf32>
    %cst_23 = arith.constant dense<0.000000e+00> : vector<8x40xf32>
    %23 = tpu.matmul %22, %20, %cst_23 {dimension_numbers = #tpu.dot_dimension_numbers<[1], [0], [0], [1], [0, 0, 1, 1], [], []>} : vector<8x4xf32>, vector<4x40xf32>, vector<8x40xf32> -> vector<8x40xf32>
    %c0_24 = arith.constant 0 : index
    %c0_25 = arith.constant 0 : index
    %c0_26 = arith.constant 0 : index
    %24 = vector.load %arg6[%c0_24, %c0_25, %c0_26] : memref<3x40x64xf32, #tpu.memory_space<vmem>>, vector<1x40x64xf32>
    %25 = vector.shape_cast %24 : vector<1x40x64xf32> to vector<40x64xf32>
    %cst_27 = arith.constant dense<0.000000e+00> : vector<8x64xf32>
    %26 = tpu.matmul %23, %25, %cst_27 {dimension_numbers = #tpu.dot_dimension_numbers<[1], [0], [0], [1], [0, 0, 1, 1], [], []>} : vector<8x40xf32>, vector<40x64xf32>, vector<8x64xf32> -> vector<8x64xf32>
    %c1_28 = arith.constant 1 : index
    %c0_29 = arith.constant 0 : index
    %c0_30 = arith.constant 0 : index
    %27 = vector.load %arg5[%c1_28, %c0_29, %c0_30] : memref<3x8x4xf32, #tpu.memory_space<vmem>>, vector<1x8x4xf32>
    %28 = vector.shape_cast %27 : vector<1x8x4xf32> to vector<8x4xf32>
    %cst_31 = arith.constant dense<0.000000e+00> : vector<8x40xf32>
    %29 = tpu.matmul %28, %20, %cst_31 {dimension_numbers = #tpu.dot_dimension_numbers<[1], [0], [0], [1], [0, 0, 1, 1], [], []>} : vector<8x4xf32>, vector<4x40xf32>, vector<8x40xf32> -> vector<8x40xf32>
    %c1_32 = arith.constant 1 : index
    %c0_33 = arith.constant 0 : index
    %c0_34 = arith.constant 0 : index
    %30 = vector.load %arg6[%c1_32, %c0_33, %c0_34] : memref<3x40x64xf32, #tpu.memory_space<vmem>>, vector<1x40x64xf32>
    %31 = vector.shape_cast %30 : vector<1x40x64xf32> to vector<40x64xf32>
    %cst_35 = arith.constant dense<0.000000e+00> : vector<8x64xf32>
    %32 = tpu.matmul %29, %31, %cst_35 {dimension_numbers = #tpu.dot_dimension_numbers<[1], [0], [0], [1], [0, 0, 1, 1], [], []>} : vector<8x40xf32>, vector<40x64xf32>, vector<8x64xf32> -> vector<8x64xf32>
    %33 = arith.addf %26, %32 : vector<8x64xf32>
    %c2_36 = arith.constant 2 : index
    %c0_37 = arith.constant 0 : index
    %c0_38 = arith.constant 0 : index
    %34 = vector.load %arg5[%c2_36, %c0_37, %c0_38] : memref<3x8x4xf32, #tpu.memory_space<vmem>>, vector<1x8x4xf32>
    %35 = vector.shape_cast %34 : vector<1x8x4xf32> to vector<8x4xf32>
    %cst_39 = arith.constant dense<0.000000e+00> : vector<8x40xf32>
    %36 = tpu.matmul %35, %20, %cst_39 {dimension_numbers = #tpu.dot_dimension_numbers<[1], [0], [0], [1], [0, 0, 1, 1], [], []>} : vector<8x4xf32>, vector<4x40xf32>, vector<8x40xf32> -> vector<8x40xf32>
    %c2_40 = arith.constant 2 : index
    %c0_41 = arith.constant 0 : index
    %c0_42 = arith.constant 0 : index
    %37 = vector.load %arg6[%c2_40, %c0_41, %c0_42] : memref<3x40x64xf32, #tpu.memory_space<vmem>>, vector<1x40x64xf32>
    %38 = vector.shape_cast %37 : vector<1x40x64xf32> to vector<40x64xf32>
    %cst_43 = arith.constant dense<0.000000e+00> : vector<8x64xf32>
    %39 = tpu.matmul %36, %38, %cst_43 {dimension_numbers = #tpu.dot_dimension_numbers<[1], [0], [0], [1], [0, 0, 1, 1], [], []>} : vector<8x40xf32>, vector<40x64xf32>, vector<8x64xf32> -> vector<8x64xf32>
    %40 = arith.addf %33, %39 : vector<8x64xf32>
    %c0_44 = arith.constant 0 : index
    %c0_45 = arith.constant 0 : index
    %41 = vector.load %arg7[%c0_44, %c0_45] : memref<1x64xf32, #tpu.memory_space<vmem>>, vector<1x64xf32>
    %42 = vector.broadcast %41 : vector<1x64xf32> to vector<8x64xf32>
    %43 = arith.addf %40, %42 : vector<8x64xf32>
    %cst_46 = arith.constant 0.000000e+00 : f32
    %44 = vector.broadcast %cst_46 : f32 to vector<8x64xf32>
    %45 = arith.maximumf %43, %44 : vector<8x64xf32>
    %c0_47 = arith.constant 0 : index
    %c0_48 = arith.constant 0 : index
    %46 = vector.load %arg8[%c0_47, %c0_48] : memref<64x144xf32, #tpu.memory_space<vmem>>, vector<64x144xf32>
    %cst_49 = arith.constant dense<0.000000e+00> : vector<8x144xf32>
    %47 = tpu.matmul %45, %46, %cst_49 {dimension_numbers = #tpu.dot_dimension_numbers<[1], [0], [0], [1], [0, 0, 1, 1], [], []>} : vector<8x64xf32>, vector<64x144xf32>, vector<8x144xf32> -> vector<8x144xf32>
    %c0_50 = arith.constant 0 : index
    %c0_51 = arith.constant 0 : index
    %c0_52 = arith.constant 0 : index
    %48 = vector.load %arg9[%c0_50, %c0_51, %c0_52] : memref<3x16x8xf32, #tpu.memory_space<vmem>>, vector<1x16x8xf32>
    %49 = vector.shape_cast %48 : vector<1x16x8xf32> to vector<16x8xf32>
    %cst_53 = arith.constant dense<0.000000e+00> : vector<16x144xf32>
    %50 = tpu.matmul %49, %47, %cst_53 {dimension_numbers = #tpu.dot_dimension_numbers<[1], [0], [0], [1], [0, 0, 1, 1], [], []>} : vector<16x8xf32>, vector<8x144xf32>, vector<16x144xf32> -> vector<16x144xf32>
    %c0_54 = arith.constant 0 : index
    %c0_55 = arith.constant 0 : index
    %c0_56 = arith.constant 0 : index
    %51 = vector.load %arg10[%c0_54, %c0_55, %c0_56] : memref<3x144x16xf32, #tpu.memory_space<vmem>>, vector<1x144x16xf32>
    %52 = vector.shape_cast %51 : vector<1x144x16xf32> to vector<144x16xf32>
    %cst_57 = arith.constant dense<0.000000e+00> : vector<16x16xf32>
    %53 = tpu.matmul %50, %52, %cst_57 {dimension_numbers = #tpu.dot_dimension_numbers<[1], [0], [0], [1], [0, 0, 1, 1], [], []>} : vector<16x144xf32>, vector<144x16xf32>, vector<16x16xf32> -> vector<16x16xf32>
    %c1_58 = arith.constant 1 : index
    %c0_59 = arith.constant 0 : index
    %c0_60 = arith.constant 0 : index
    %54 = vector.load %arg9[%c1_58, %c0_59, %c0_60] : memref<3x16x8xf32, #tpu.memory_space<vmem>>, vector<1x16x8xf32>
    %55 = vector.shape_cast %54 : vector<1x16x8xf32> to vector<16x8xf32>
    %cst_61 = arith.constant dense<0.000000e+00> : vector<16x144xf32>
    %56 = tpu.matmul %55, %47, %cst_61 {dimension_numbers = #tpu.dot_dimension_numbers<[1], [0], [0], [1], [0, 0, 1, 1], [], []>} : vector<16x8xf32>, vector<8x144xf32>, vector<16x144xf32> -> vector<16x144xf32>
    %c1_62 = arith.constant 1 : index
    %c0_63 = arith.constant 0 : index
    %c0_64 = arith.constant 0 : index
    %57 = vector.load %arg10[%c1_62, %c0_63, %c0_64] : memref<3x144x16xf32, #tpu.memory_space<vmem>>, vector<1x144x16xf32>
    %58 = vector.shape_cast %57 : vector<1x144x16xf32> to vector<144x16xf32>
    %cst_65 = arith.constant dense<0.000000e+00> : vector<16x16xf32>
    %59 = tpu.matmul %56, %58, %cst_65 {dimension_numbers = #tpu.dot_dimension_numbers<[1], [0], [0], [1], [0, 0, 1, 1], [], []>} : vector<16x144xf32>, vector<144x16xf32>, vector<16x16xf32> -> vector<16x16xf32>
    %60 = arith.addf %53, %59 : vector<16x16xf32>
    %c2_66 = arith.constant 2 : index
    %c0_67 = arith.constant 0 : index
    %c0_68 = arith.constant 0 : index
    %61 = vector.load %arg9[%c2_66, %c0_67, %c0_68] : memref<3x16x8xf32, #tpu.memory_space<vmem>>, vector<1x16x8xf32>
    %62 = vector.shape_cast %61 : vector<1x16x8xf32> to vector<16x8xf32>
    %cst_69 = arith.constant dense<0.000000e+00> : vector<16x144xf32>
    %63 = tpu.matmul %62, %47, %cst_69 {dimension_numbers = #tpu.dot_dimension_numbers<[1], [0], [0], [1], [0, 0, 1, 1], [], []>} : vector<16x8xf32>, vector<8x144xf32>, vector<16x144xf32> -> vector<16x144xf32>
    %c2_70 = arith.constant 2 : index
    %c0_71 = arith.constant 0 : index
    %c0_72 = arith.constant 0 : index
    %64 = vector.load %arg10[%c2_70, %c0_71, %c0_72] : memref<3x144x16xf32, #tpu.memory_space<vmem>>, vector<1x144x16xf32>
    %65 = vector.shape_cast %64 : vector<1x144x16xf32> to vector<144x16xf32>
    %cst_73 = arith.constant dense<0.000000e+00> : vector<16x16xf32>
    %66 = tpu.matmul %63, %65, %cst_73 {dimension_numbers = #tpu.dot_dimension_numbers<[1], [0], [0], [1], [0, 0, 1, 1], [], []>} : vector<16x144xf32>, vector<144x16xf32>, vector<16x16xf32> -> vector<16x16xf32>
    %67 = arith.addf %60, %66 : vector<16x16xf32>
    %c0_74 = arith.constant 0 : index
    %c0_75 = arith.constant 0 : index
    %68 = vector.load %arg11[%c0_74, %c0_75] : memref<1x16xf32, #tpu.memory_space<vmem>>, vector<1x16xf32>
    %69 = vector.broadcast %68 : vector<1x16xf32> to vector<16x16xf32>
    %70 = arith.addf %67, %69 : vector<16x16xf32>
    %71 = math.tanh %70 : vector<16x16xf32>
    %c0_76 = arith.constant 0 : index
    %c0_77 = arith.constant 0 : index
    %c0_78 = arith.constant 0 : index
    %72 = vector.load %arg12[%c0_76, %c0_77, %c0_78] : memref<1x16x16xf32, #tpu.memory_space<vmem>>, vector<1x16x16xf32>
    %73 = vector.shape_cast %72 : vector<1x16x16xf32> to vector<16x16xf32>
    %74 = vector.shape_cast %71 : vector<16x16xf32> to vector<1x16x16xf32>
    tpu.vector_store %arg12[%c0_76, %c0_77, %c0_78], %74 {strides = array<i32>} : memref<1x16x16xf32, #tpu.memory_space<vmem>>, vector<1x16x16xf32>,
    return
  }
  func.func @transform_0(%arg0: i32) -> (i32, i32, i32) {
    %c0_i32 = arith.constant 0 : i32
    %c0_i32_0 = arith.constant 0 : i32
    %c0_i32_1 = arith.constant 0 : i32
    return %arg0, %c0_i32, %c0_i32_0 : i32, i32, i32
  }
  func.func @transform_1(%arg0: i32) -> (i32, i32, i32) {
    %c0_i32 = arith.constant 0 : i32
    %c0_i32_0 = arith.constant 0 : i32
    %c0_i32_1 = arith.constant 0 : i32
    %c0_i32_2 = arith.constant 0 : i32
    return %c0_i32, %c0_i32_0, %c0_i32_1 : i32, i32, i32
  }
  func.func @transform_2(%arg0: i32) -> (i32, i32) {
    %c0_i32 = arith.constant 0 : i32
    %c0_i32_0 = arith.constant 0 : i32
    %c0_i32_1 = arith.constant 0 : i32
    return %c0_i32, %c0_i32_0 : i32, i32
  }
  func.func @transform_3(%arg0: i32) -> (i32, i32) {
    %c0_i32 = arith.constant 0 : i32
    %c0_i32_0 = arith.constant 0 : i32
    %c0_i32_1 = arith.constant 0 : i32
    return %c0_i32, %c0_i32_0 : i32, i32
  }
  func.func @transform_4(%arg0: i32) -> (i32, i32, i32) {
    %c0_i32 = arith.constant 0 : i32
    %c0_i32_0 = arith.constant 0 : i32
    %c0_i32_1 = arith.constant 0 : i32
    %c0_i32_2 = arith.constant 0 : i32
    return %c0_i32, %c0_i32_0, %c0_i32_1 : i32, i32, i32
  }
  func.func @transform_5(%arg0: i32) -> (i32, i32, i32) {
    %c0_i32 = arith.constant 0 : i32
    %c0_i32_0 = arith.constant 0 : i32
    %c0_i32_1 = arith.constant 0 : i32
    %c0_i32_2 = arith.constant 0 : i32
    return %c0_i32, %c0_i32_0, %c0_i32_1 : i32, i32, i32
  }
  func.func @transform_6(%arg0: i32) -> (i32, i32) {
    %c0_i32 = arith.constant 0 : i32
    %c0_i32_0 = arith.constant 0 : i32
    %c0_i32_1 = arith.constant 0 : i32
    return %c0_i32, %c0_i32_0 : i32, i32
  }
  func.func @transform_7(%arg0: i32) -> (i32, i32) {
    %c0_i32 = arith.constant 0 : i32
    %c0_i32_0 = arith.constant 0 : i32
    %c0_i32_1 = arith.constant 0 : i32
    return %c0_i32, %c0_i32_0 : i32, i32
  }
  func.func @transform_8(%arg0: i32) -> (i32, i32, i32) {
    %c0_i32 = arith.constant 0 : i32
    %c0_i32_0 = arith.constant 0 : i32
    %c0_i32_1 = arith.constant 0 : i32
    %c0_i32_2 = arith.constant 0 : i32
    return %c0_i32, %c0_i32_0, %c0_i32_1 : i32, i32, i32
  }
  func.func @transform_9(%arg0: i32) -> (i32, i32, i32) {
    %c0_i32 = arith.constant 0 : i32
    %c0_i32_0 = arith.constant 0 : i32
    %c0_i32_1 = arith.constant 0 : i32
    %c0_i32_2 = arith.constant 0 : i32
    return %c0_i32, %c0_i32_0, %c0_i32_1 : i32, i32, i32
  }
  func.func @transform_10(%arg0: i32) -> (i32, i32) {
    %c0_i32 = arith.constant 0 : i32
    %c0_i32_0 = arith.constant 0 : i32
    %c0_i32_1 = arith.constant 0 : i32
    return %c0_i32, %c0_i32_0 : i32, i32
  }
  func.func @transform_11(%arg0: i32) -> (i32, i32, i32) {
    %c0_i32 = arith.constant 0 : i32
    %c0_i32_0 = arith.constant 0 : i32
    %c0_i32_1 = arith.constant 0 : i32
    return %arg0, %c0_i32, %c0_i32_0 : i32, i32, i32
  }
}

</mosaic_0001>

<bundles_post_ra>
// kernel: conv_mlp_decoder_forward.1
= control target key start
LH: loop header
LB: loop body
LE: loop exit
PB: predicated region body
PF: predicated region fallthrough
CT: control target
= control target key end

     0   :  { %s3328_s0 = inlined_call_operand.vmem [shape: f32[2,1,8], index: 0, kind: input, shape index: {}]   ;;  %s3329_s1 = inlined_call_operand.hbm [shape: f32[4,8,16], index: 1, kind: input, shape index: {}]   ;;  %s3330_s2 = inlined_call_operand.hbm [shape: f32[4,16], index: 2, kind: input, shape index: {}]   ;;  %s3331_s3 = inlined_call_operand.hbm [shape: f32[16,40], index: 3, kind: input, shape index: {}]   ;;  %s3332_s4 = inlined_call_operand.vmem [shape: f32[3,8,4], index: 4, kind: input, shape index: {}]   ;;  %s3333_s5 = inlined_call_operand.hbm [shape: f32[3,40,64], index: 5, kind: input, shape index: {}]   ;;  %s3334_s6 = inlined_call_operand.vmem [shape: f32[1,64], index: 6, kind: input, shape index: {}]   ;;  %s3335_s7 = inlined_call_operand.hbm [shape: f32[64,144], index: 7, kind: input, shape index: {}]   ;;  %s3336_s8 = inlined_call_operand.hbm [shape: f32[3,16,8], index: 8, kind: input, shape index: {}]   ;;  %s3337_s9 = inlined_call_operand.hbm [shape: f32[3,144,16], index: 9, kind: input, shape index: {}]   ;;  %s3338_s10 = inlined_call_operand.vmem [shape: f32[1,16], index: 10, kind: input, shape index: {}]   ;;  %s3339_s11 = inlined_call_operand.hbm [shape: f32[2,16,16], index: 11, kind: output, shape index: {}]  }
   0x1   :  { %3350 = sst [smem:[#allocation26_spill]] %s3330_s2 }
   0x2   :  { %3351 = sst [smem:[#allocation27_spill]] %s3333_s5 }
   0x3   :  { %16 = vsyncpa [#allocation3], 0 }
   0x4   :  { %17 = vsyncpa [#allocation6], 0 }
   0x5   :  { %18 = vsyncpa [#allocation9], 0 }
   0x6   :  { %19 = vsyncpa [#allocation12], 0 }
   0x7   :  { %20 = vsyncpa [#allocation4], 0 }
   0x8   :  { %22 = vsyncpa [#allocation4 + $0x1], 0  ;;  %s2911_s17 = smov 0   ;;  %s2913_s18 = smov 0  }
   0x9   :  { %s2915_s19 = smov 0   ;;  %s2917_s20 = smov 0  }
   0xa LB: > { %3352 = sst [smem:[#allocation20_spill]] %s2820_s17  ;;  %s2932_s21 = sadd.s32 4294967295, %s2832_s20   ;;  %s2832_s20 = sphi %s2917_s20, %s3380_s20   ;;  %s2828_s19 = sphi %s2915_s19, %s3382_s19   ;;  %s2824_s18 = sphi %s2913_s18, %s3384_s18   ;;  %s2820_s17 = sphi %s2911_s17, %s3383_s17  }
   0xb   : > { %3353 = sst [smem:[#allocation21_spill]] %s2828_s19  ;;  %s2145_s22 = sadd.s32 4294967294, %s2832_s20  }
   0xc   : > { %3354 = sst [smem:[#allocation22_spill]] %s2832_s20  ;;  %s2936_s23 = sadd.s32 1, %s2832_s20  }
   0xd   : > { %3355 = sst [smem:[#allocation23_spill]] %s2936_s23  ;;  %s271_s24 = sadd.s32 1, %s2828_s19 }
   0xe   : > { %s268_s25 = ssub.s32 %s2832_s20, %s2936_s23  ;;  %p281_p0 = scmp.ne.s32.totalorder %s2828_s19, %s2824_s18 }
   0xf   : > { %p269_p1 = scmp.eq.s32.totalorder %s268_s25, 0  ;;  %p282_p2 = scmp.eq.s32.totalorder %s2932_s21, 1 }
  0x10   : > { %p287_p3 = scmp.ne.s32.totalorder %s2824_s18, %s2820_s17  ;;  %p288_p4 = scmp.eq.s32.totalorder %s2145_s22, 1 }
  0x11   : > { %s2947_s26 = scalar_select %p269_p1, %s2828_s19, %s271_s24  }
  0x12   : > { %p2949_p5 = por %p282_p2, %p281_p0  ;;  %p2953_p6 = por %p288_p4, %p287_p3 }
  0x13   : > { %3356 = sst [smem:[#allocation24_spill]] %s2947_s26  ;;  %p2146_p7 = scmp.ge.s32.totalorder %s2832_s20, 1 }
  0x14   : > { %s3357_s27 = scalar_select %p2949_p5, 1, 0 }
  0x15   : > { %s3358_s28 = scalar_select %p2953_p6, 1, 0 }
  0x16   : > { %p295_p8 = scmp.lt.s32.totalorder %s2832_s20, 3  ;;  %p3343_p9 = scmp.eq.s32.totalorder %s2932_s21, 0 }
  0x17   : > { %3359 = sst [smem:[#allocation25_spill]] %s3358_s28  ;;  %s2834_s30 = smov [#allocation5]  }
  0x18   : > { %p2960_p10 = pnand %p2146_p7, %p295_p8  ;;  %s321_s12 = sshll.u32 %s2834_s30, 4  ;;  %s322_s12 = int_to_ptr.vmem [resolvable:$true] %s321_s12 }
  0x19   : > { %s2835_s14 = smov [#allocation8]   ;;  %s2836_s16 = smov [#allocation11]  }
  0x1a   : > { %s3360_s29 = scalar_select %p2960_p10, 1, 0 }
  0x1b   : > { %p2465_p11 = pneg %p2960_p10  ;;  %s347_s15 = sshll.u32 %s2835_s14, 4  ;;  %s2972_s15 = int_to_ptr.vmem [resolvable:$true] %s347_s15 }
  0x1c   : > { %s2974_s22 = sshll.u32 %s2836_s16, 4  ;;  %s3362_s2 = sld [smem:[#allocation26_spill]]  ;;  %s377_s22 = int_to_ptr.vmem [resolvable:$true] %s2974_s22 }
  0x1d   : > { %p2968_p12 = pnand %p3343_p9, %p2465_p11 }
  0x1f   : > { %p2984_p0 = pneg %p2968_p12 }
  0x22   : > { %s2558_s30 = scalar_lea.hbm %s3362_s2, 64 }
  0x23   : > { %p2559_p13 = scmp.ne.s32.totalorder %s3362_s2, %s2558_s30  ;;  %p2565_p3 = scmp.lt.u32.totalorder %s2558_s30, %s3362_s2 }
  0x25   : > { %p2561_p1 = pnand %p2984_p0, %p2559_p13 }
  0x27   : > { %p2562_p2 = pneg %p2561_p1 }
  0x29   : > { %p2567_p4 = pnand %p2565_p3, %p2562_p2 }
  0x2b   : > { %2570 = shalt.err (!%p2567_p4)
}
  0x2c   : > { %s2571_s24 = scalar_lea.vmem %s322_s12, 64  ;;  %p2579_p9 = scmp.lt.s32.totalorder %s322_s12, %s322_s12 }
  0x2d   : > { %p2572_p7 = scmp.ne.s32.totalorder %s322_s12, %s2571_s24  ;;  %p2580_p6 = scmp.lt.s32.totalorder %s2571_s24, %s2571_s24 }
  0x2f   : > { %p2574_p8 = pnand %p2572_p7, %p2984_p0  ;;  %p2581_p5 = por %p2580_p6, %p2579_p9 }
  0x31   : > { %p2575_p11 = pneg %p2574_p8 }
  0x33   : > { %p2582_p10 = pnand %p2581_p5, %p2575_p11 }
  0x35   : > { %2585 = shalt.err (!%p2582_p10)
}
  0x36   : > { %2471 = dma.hbm_to_vmem [thread:$0]  (!%p2968_p12), %s3362_s2, 64, %s322_s12, [#allocation6]  }
  0x37   : > { %s3364_s5 = sld [smem:[#allocation27_spill]] }
  0x3d   : > { %s2586_s14 = scalar_lea.hbm %s3364_s5, 1920 }
  0x3e   : > { %p2587_p13 = scmp.ne.s32.totalorder %s3364_s5, %s2586_s14  ;;  %p2593_p5 = scmp.lt.u32.totalorder %s2586_s14, %s3364_s5 }
  0x40   : > { %p2589_p1 = pnand %p2587_p13, %p2984_p0 }
  0x42   : > { %p2590_p6 = pneg %p2589_p1 }
  0x44   : > { %p2595_p9 = pnand %p2593_p5, %p2590_p6 }
  0x46   : > { %2598 = shalt.err (!%p2595_p9)
}
  0x47   : > { %s2599_s12 = scalar_lea.vmem %s2972_s15, 1920  ;;  %p2607_p4 = scmp.lt.s32.totalorder %s2972_s15, %s2972_s15 }
  0x48   : > { %p2600_p10 = scmp.ne.s32.totalorder %s2972_s15, %s2599_s12  ;;  %p2608_p7 = scmp.lt.s32.totalorder %s2599_s12, %s2599_s12 }
  0x4a   : > { %p2602_p2 = pnand %p2600_p10, %p2984_p0  ;;  %p2609_p8 = por %p2608_p7, %p2607_p4 }
  0x4c   : > { %p2603_p3 = pneg %p2602_p2 }
  0x4e   : > { %p2610_p11 = pnand %p2609_p8, %p2603_p3 }
  0x50   : > { %2613 = shalt.err (!%p2610_p11)
}
  0x51   : > { %s3349_s28 = smov 128   ;;  %s2838_s17 = smov 8  }
  0x52   : > { %2477 = dma.hbm_to_vmem [thread:$0]  (!%p2968_p12), %s3364_s5, 1920, %s2972_s15, [#allocation9], %s3349_s28, %s3349_s28, %s2838_s17  }
  0x53   : > { %s2614_s14 = scalar_lea.hbm %s3336_s8, 768 }
  0x54   : > { %p2615_p13 = scmp.ne.s32.totalorder %s3336_s8, %s2614_s14  ;;  %p2621_p5 = scmp.lt.u32.totalorder %s2614_s14, %s3336_s8 }
  0x56   : > { %p2617_p1 = pnand %p2615_p13, %p2984_p0 }
  0x58   : > { %p2618_p6 = pneg %p2617_p1 }
  0x5a   : > { %p2623_p9 = pnand %p2621_p5, %p2618_p6 }
  0x5c   : > { %2626 = shalt.err (!%p2623_p9)
}
  0x5d   : > { %s2627_s19 = scalar_lea.vmem %s377_s22, 768  ;;  %p2635_p4 = scmp.lt.s32.totalorder %s377_s22, %s377_s22 }
  0x5e   : > { %p2628_p10 = scmp.ne.s32.totalorder %s377_s22, %s2627_s19  ;;  %p2636_p7 = scmp.lt.s32.totalorder %s2627_s19, %s2627_s19 }
  0x60   : > { %p2630_p2 = pnand %p2628_p10, %p2984_p0  ;;  %p2637_p8 = por %p2636_p7, %p2635_p4 }
  0x62   : > { %p2631_p3 = pneg %p2630_p2 }
  0x64   : > { %p2638_p11 = pnand %p2637_p8, %p2631_p3 }
  0x66   : > { %2641 = shalt.err (!%p2638_p11)
}
  0x67   : > { %2483 = dma.hbm_to_vmem [thread:$0]  (!%p2968_p12), %s3336_s8, 768, %s377_s22, [#allocation12], %s3349_s28, %s3349_s28, %s2838_s17  }
  0x68   : > { %s2839_s26 = smov [#allocation2]   ;;  %s2840_s30 = smov [#allocation7]  }
  0x69   : > { %s307_s25 = sshll.u32 %s2839_s26, 4  ;;  %s331_s14 = sshll.u32 %s2840_s30, 4  ;;  %s308_s25 = int_to_ptr.vmem [resolvable:$true] %s307_s25  ;;  %s332_s14 = int_to_ptr.vmem [resolvable:$true] %s331_s14 }
  0x6a   : > { %s2642_s12 = scalar_lea.hbm %s3329_s1, 512 }
  0x6b   : > { %p2643_p13 = scmp.ne.s32.totalorder %s3329_s1, %s2642_s12  ;;  %p2649_p5 = scmp.lt.u32.totalorder %s2642_s12, %s3329_s1 }
  0x6d   : > { %p2645_p1 = pnand %p2643_p13, %p2984_p0 }
  0x6f   : > { %p2646_p6 = pneg %p2645_p1 }
  0x71   : > { %p2651_p9 = pnand %p2649_p5, %p2646_p6 }
  0x73   : > { %2654 = shalt.err (!%p2651_p9)
}
  0x74   : > { %s2655_s22 = scalar_lea.vmem %s308_s25, 512  ;;  %p2663_p4 = scmp.lt.s32.totalorder %s308_s25, %s308_s25 }
  0x75   : > { %p2656_p10 = scmp.ne.s32.totalorder %s308_s25, %s2655_s22  ;;  %p2664_p7 = scmp.lt.s32.totalorder %s2655_s22, %s2655_s22 }
  0x77   : > { %p2658_p2 = pnand %p2656_p10, %p2984_p0  ;;  %p2665_p8 = por %p2664_p7, %p2663_p4 }
  0x79   : > { %p2659_p3 = pneg %p2658_p2 }
  0x7b   : > { %p2666_p11 = pnand %p2665_p8, %p2659_p3 }
  0x7d   : > { %2669 = shalt.err (!%p2666_p11)
}
  0x7e   : > { %2468 = dma.hbm_to_vmem [thread:$0]  (!%p2968_p12), %s3329_s1, 512, %s308_s25, [#allocation3], %s3349_s28, %s3349_s28, %s2838_s17  }
  0x7f   : > { %s2670_s30 = scalar_lea.hbm %s3331_s3, 256 }
  0x80   : > { %p2671_p13 = scmp.ne.s32.totalorder %s3331_s3, %s2670_s30  ;;  %p2677_p5 = scmp.lt.u32.totalorder %s2670_s30, %s3331_s3 }
  0x82   : > { %p2673_p1 = pnand %p2671_p13, %p2984_p0 }
  0x84   : > { %p2674_p6 = pneg %p2673_p1 }
  0x86   : > { %p2679_p9 = pnand %p2677_p5, %p2674_p6 }
  0x88   : > { %2682 = shalt.err (!%p2679_p9)
}
  0x89   : > { %s2683_s2 = scalar_lea.vmem %s332_s14, 256  ;;  %p2691_p4 = scmp.lt.s32.totalorder %s332_s14, %s332_s14 }
  0x8a   : > { %p2684_p10 = scmp.ne.s32.totalorder %s332_s14, %s2683_s2  ;;  %p2692_p7 = scmp.lt.s32.totalorder %s2683_s2, %s2683_s2 }
  0x8c   : > { %p2686_p2 = pnand %p2684_p10, %p2984_p0  ;;  %p2693_p8 = por %p2692_p7, %p2691_p4 }
  0x8e   : > { %p2687_p3 = pneg %p2686_p2 }
  0x90   : > { %p2694_p11 = pnand %p2693_p8, %p2687_p3 }
  0x92   : > { %2697 = shalt.err (!%p2694_p11)
}
  0x93   : > { %2474 = dma.hbm_to_vmem [thread:$0]  (!%p2968_p12), %s3331_s3, 256, %s332_s14, [#allocation6], %s3349_s28, %s3349_s28, %s2838_s17  }
  0x94   : > { %s2841_s5 = smov [#allocation10]   ;;  %s2698_s30 = scalar_lea.hbm %s3335_s7, 2048 }
  0x95   : > { %s363_s20 = sshll.u32 %s2841_s5, 4  ;;  %p2699_p13 = scmp.ne.s32.totalorder %s3335_s7, %s2698_s30  ;;  %s364_s20 = int_to_ptr.vmem [resolvable:$true] %s363_s20 }
  0x96   : > { %p2705_p5 = scmp.lt.u32.totalorder %s2698_s30, %s3335_s7 }
  0x97   : > { %p2701_p1 = pnand %p2699_p13, %p2984_p0 }
  0x99   : > { %p2702_p6 = pneg %p2701_p1 }
  0x9b   : > { %p2707_p9 = pnand %p2705_p5, %p2702_p6 }
  0x9d   : > { %2710 = shalt.err (!%p2707_p9)
}
  0x9e   : > { %s2711_s14 = scalar_lea.vmem %s364_s20, 2048  ;;  %p2719_p4 = scmp.lt.s32.totalorder %s364_s20, %s364_s20 }
  0x9f   : > { %p2712_p10 = scmp.ne.s32.totalorder %s364_s20, %s2711_s14  ;;  %p2720_p7 = scmp.lt.s32.totalorder %s2711_s14, %s2711_s14 }
  0xa1   : > { %p2714_p2 = pnand %p2712_p10, %p2984_p0  ;;  %p2721_p8 = por %p2720_p7, %p2719_p4 }
  0xa3   : > { %p2715_p3 = pneg %p2714_p2 }
  0xa5   : > { %p2722_p11 = pnand %p2721_p8, %p2715_p3 }
  0xa7   : > { %2725 = shalt.err (!%p2722_p11)
}
  0xa8   : > { %s2842_s2 = smov 256   ;;  %s2843_s25 = smov 16  }
  0xa9   : > { %2480 = dma.hbm_to_vmem [thread:$0]  (!%p2968_p12), %s3335_s7, 2048, %s364_s20, [#allocation9], %s2842_s2, %s2842_s2, %s2843_s25  }
  0xaa   : > { %s2844_s15 = smov [#allocation13]   ;;  %s2726_s24 = scalar_lea.hbm %s3337_s9, 6912 }
  0xab   : > { %s389_s26 = sshll.u32 %s2844_s15, 4  ;;  %p2727_p13 = scmp.ne.s32.totalorder %s3337_s9, %s2726_s24  ;;  %s390_s26 = int_to_ptr.vmem [resolvable:$true] %s389_s26 }
  0xac   : > { %p2733_p5 = scmp.lt.u32.totalorder %s2726_s24, %s3337_s9 }
  0xad   : > { %p2729_p1 = pnand %p2727_p13, %p2984_p0 }
  0xaf   : > { %p2730_p6 = pneg %p2729_p1 }
  0xb1   : > { %p2735_p9 = pnand %p2733_p5, %p2730_p6 }
  0xb3   : > { %2738 = shalt.err (!%p2735_p9)
}
  0xb4   : > { %s2739_s20 = scalar_lea.vmem %s390_s26, 6912  ;;  %p2747_p4 = scmp.lt.s32.totalorder %s390_s26, %s390_s26 }
  0xb5   : > { %p2740_p10 = scmp.ne.s32.totalorder %s390_s26, %s2739_s20  ;;  %p2748_p7 = scmp.lt.s32.totalorder %s2739_s20, %s2739_s20 }
  0xb7   : > { %p2742_p2 = pnand %p2740_p10, %p2984_p0  ;;  %p2749_p8 = por %p2748_p7, %p2747_p4 }
  0xb9   : > { %p2743_p3 = pneg %p2742_p2 }
  0xbb   : > { %p2750_p11 = pnand %p2749_p8, %p2743_p3 }
  0xbd   : > { %2753 = shalt.err (!%p2750_p11)
}
  0xbe   : > { %s3365_s2 = smov 128   ;;  %p3366_p13 = scmp.ne.s32.totalorder %s3360_s29, 0 }
  0xbf   : > { %2486 = dma.hbm_to_vmem [thread:$0]  (!%p2968_p12), %s3337_s9, 6912, %s390_s26, [#allocation12], %s3365_s2, %s3365_s2, %s2838_s17  }
  0xc0   : > { %414 = sbr.rel (%p3366_p13) target bundleno = 2195 (0x893), region = 64  ;;  %p3367_p0 = scmp.eq.s32.totalorder (!%p3366_p13), %s2932_s21, 0 }
  0xc7   : > { %2799 = dma.done.wait (%p3367_p0), [#allocation3], 512   ;;  %p3368_p1 = pmov %p3367_p0 }
  0xc8   : > { %p3369_p6 = pmov %p3367_p0 }
  0xc9   : > { %2801 = vsyncadd (%p3368_p1), [#allocation3], 4294966784 }
  0xca   : > { %2803 = dma.done.wait (%p3369_p6), [#allocation6], 320   ;;  %p3370_p5 = pmov %p3367_p0 }
  0xcb   : > { %p3371_p9 = pmov %p3367_p0 }
  0xcc   : > { %2805 = vsyncadd (%p3370_p5), [#allocation6], 4294966976 }
  0xcd   : > { %2807 = dma.done.wait (%p3371_p9), [#allocation9], 3968   ;;  %p3372_p12 = pmov %p3367_p0 }
  0xce   : > { %p3373_p10 = pmov %p3367_p0 }
  0xcf   : > { %2809 = vsyncadd (%p3372_p12), [#allocation9], 4294963328 }
  0xd0   : > { %2811 = dma.done.wait (%p3373_p10), [#allocation12], 7680   ;;  %p3374_p2 = pmov %p3367_p0 }
  0xd1   : > { %p476_p3 = scmp.lt.s32.totalorder %s2932_s21, 1  ;;  %v2845_v0 = vmov 0.0   ;;  %vm2846_vm0 = vmmov 0   ;;  %vm481_vm1 = vcmask 64512   ;;  %v480_v1 = vld [vmem:[#allocation2] sm:$0xff]  ;;  %v556_v2 = vld [vmem:[#allocation2 + $0x8] sm:$0xff] }
  0xd2   : > { %2813 = vsyncadd (%p3374_p2), [#allocation12], 4294959616  ;;  %2236 = vmatprep.subr.mxu0 %v2845_v0  ;;  %2241 = vmatprep.subr.mxu1 %v2845_v0  ;;  %v628_v4 = vld [vmem:[#allocation2 + $0x10] sm:$0xff]  ;;  %v700_v5 = vld [vmem:[#allocation2 + $0x18] sm:$0xff]  ;;  %v2847_v9 = vmov 0.0|0.0   ;;  %vm780_vm2 = vcmask 1040384  }
  0xd3   : > { %2238 = vmatprep.mubr.msk.f32.mxu0 %vm2846_vm0, %v2845_v0  ;;  %2243 = vmatprep.mubr.msk.f32.mxu1 %vm2846_vm0, %v2845_v0  ;;  %s477_s23 = scalar_select %p476_p3, %s2932_s21, 1  ;;  %v789_v6 = vld [vmem:[#allocation7] sm:$0xff]  ;;  %v790_v7 = vld [vmem:[#allocation7 + $0x8] sm:$0xff]  ;;  %vm782_vm3 = vcmask 1041408   ;;  %vm784_vm4 = vcmask 1042432   ;;  %vm791_vm5 = vcmask 130048  }
  0xd4   : > { %2237 = vmatpush3.msra.mxu0 %v480_v1  ;;  %2242 = vmatpush3.msra.mxu1 %v556_v2  ;;  %v2318_v8 = vpack.c.bf16 %v790_v7, %v789_v6  ;;  %v786_v22 = vld [vmem:[#allocation5] sm:$0xf]  ;;  %v1026_v28 = vld [vmem:[#allocation8 + $0x30] sm:$0xff]  ;;  %v944_v29 = vld [vmem:[#allocation8] sm:$0xff]  ;;  %vm870_vm6 = vcmask 1043456   ;;  %vm866_vm7 = vcmask 31744  }
  0xd5   : > { %s478_s17 = scalar_lea.vmem %s3328_s0, %s477_s23  ;;  %2246 = vmatprep.subr.mxu0 %v2845_v0  ;;  %2251 = vmatprep.subr.mxu1 %v2845_v0  ;;  %v1025_v27 = vld [vmem:[#allocation8 + $0x28] sm:$0xff]  ;;  %v2171_v32 = vld [vmem:[%s3332_s4 + $0x8] sm:$0xff]  ;;  %v1028_v38 = vld [vmem:[#allocation8 + $0x40] sm:$0xff]  ;;  %vm1030_vm8 = vcmask 326656   ;;  %vm1357_vm9 = vcmask 523264   ;;  %s473_s20 = sand.u32 1, %s2824_s18  }
  0xd6   : > { %v479_v3 = vld [vmem:[%s478_s17] sm:$0x1]  ;;  %v2321_v34 = vpack.c.bf16 %v1026_v28, %v1025_v27  ;;  %v1027_v36 = vld [vmem:[#allocation8 + $0x38] sm:$0xff]  ;;  %v946_v39 = vld [vmem:[#allocation8 + $0x10] sm:$0xff]  ;;  %s2163_s2 = sshll.u32 %s473_s20, 4  ;;  %s2200_s28 = sshll.u32 %s2932_s21, 8 }
  0xd7   : > { %2239 = vmatmul.mubr.msk.f32.vlgmr.msra.gmra.mrb[0].mxu0 %vm481_vm1, %v479_v3  ;;  %2244 = vmatmul.mubr.msk.f32.vlgmr.msra.gmra.mrb[0].mxu1 %vm481_vm1, %v479_v3  ;;  %v945_v30 = vld [vmem:[#allocation8 + $0x8] sm:$0xff]  ;;  %v947_v40 = vld [vmem:[#allocation8 + $0x18] sm:$0xff]  ;;  %v2324_v41 = vpack.c.bf16 %v1028_v38, %v1027_v36  ;;  %v948_v44 = vld [vmem:[#allocation8 + $0x20] sm:$0xff]  ;;  %s475_s25 = scalar_lea.vmem [#allocation14], %s2163_s2  ;;  %s3282_s17 = scalar_lea.hbm %s3339_s11, %s2200_s28 }
  0xd8   : > { %2247 = vmatpush3.msra.mxu0 %v628_v4  ;;  %2248 = vmatprep.mubr.msk.f32.mxu0 %vm2846_vm0, %v2845_v0  ;;  %v865_v31 = vld [vmem:[%s3332_s4] sm:$0xff]  ;;  %v2327_v35 = vpack.c.bf16 %v945_v30, %v944_v29  ;;  %v2330_v42 = vpack.c.bf16 %v947_v40, %v946_v39  ;;  %v1254_v46 = vld [vmem:[#allocation8 + $0x58] sm:$0xff]  ;;  %v1255_v53 = vld [vmem:[#allocation8 + $0x60] sm:$0xff]  ;;  %s2017_s23 = sshll.u32 %s475_s25, 4  ;;  %s3287_s22 = scalar_lea.sflag [#allocation4], %s473_s20  ;;  %s3284_s23 = int_to_ptr.vmem [resolvable:$true] %s2017_s23 }
  0xd9   : > { %2252 = vmatpush3.msra.mxu1 %v700_v5  ;;  %2253 = vmatprep.mubr.msk.f32.mxu1 %vm2846_vm0, %v2845_v0  ;;  %v1029_v43 = vld [vmem:[#allocation8 + $0x48] sm:$0xff]  ;;  %v1253_v45 = vld [vmem:[#allocation8 + $0x50] sm:$0xff]  ;;  %v2176_v52 = vld [vmem:[%s3332_s4 + $0x10] sm:$0xff]  ;;  %s2754_s21 = scalar_lea.vmem %s3284_s23, 256  ;;  %p3375_p7 = scmp.ne.s32.totalorder %s3357_s27, 0 }
  0xda   : > { %2263 = vmatprep.subr.mxu1 %v2845_v0  ;;  %2317 = vmatprep.subr.bf16.mxu0 %v2847_v9  ;;  %v2333_v47 = vpack.c.bf16 %v1254_v46, %v1253_v45  ;;  %v1256_v54 = vld [vmem:[#allocation8 + $0x68] sm:$0xff]  ;;  %v1257_v56 = vld [vmem:[#allocation8 + $0x70] sm:$0xff]  ;;  %v1342_v57 = vld [vmem:[#allocation10 + $0x8] sm:$0xff]  ;;  %p2755_p4 = scmp.ne.s32.totalorder %s3284_s23, %s2754_s21  ;;  %s2848_s5 = smov [#allocation14]  }
  0xdb   : > { %2249 = vmatmul.mubr.msk.f32.vlgmr.msra.gmra.mrb[2].mxu0 %vm481_vm1, %v479_v3  ;;  %2254 = vmatmul.mubr.msk.f32.vlgmr.msra.gmra.mrb[2].mxu1 %vm481_vm1, %v479_v3  ;;  %v2336_v55 = vpack.c.bf16 %v1256_v54, %v1255_v53  ;;  %v1344_v58 = vld [vmem:[#allocation10 + $0x18] sm:$0xff]  ;;  %v1341_v60 = vld [vmem:[#allocation10] sm:$0xff]  ;;  %v1343_v61 = vld [vmem:[#allocation10 + $0x10] sm:$0xff]  ;;  %s2758_s15 = sshll.u32 %s2848_s5, 4  ;;  %s2759_s15 = int_to_ptr.vmem [resolvable:$false] %s2758_s15 }
  0xdc   : > { %2260 = vmatprep.mubr.msk.f32.mxu0 %vm2846_vm0, %v2845_v0  ;;  %2265 = vmatprep.mubr.msk.f32.mxu1 %vm2846_vm0, %v2845_v0  ;;  %v2338_v59 = vpack.c.bf16 %v1344_v58, %v1342_v57  ;;  %v1346_v1 = vld [vmem:[#allocation10 + $0x28] sm:$0xff]  ;;  %v1348_v2 = vld [vmem:[#allocation10 + $0x38] sm:$0xff]  ;;  %v2340_v6 = vpack.c.bf16 %v1343_v61, %v1341_v60  ;;  %v2180_v27 = vld [vmem:[%s3334_s6] ss:$0 sm:$0xff]  ;;  %p2756_p8 = pnand %p2755_p4, %p3375_p7  ;;  %s2760_s26 = scalar_lea.vmem %s2759_s15, 512 }
  0xdd   : > { %2319 = vmatpush3.bf16.msra.mxu0 %v2318_v8  ;;  %v2342_v7 = vpack.c.bf16 %v1348_v2, %v1346_v1  ;;  %v1345_v8 = vld [vmem:[#allocation10 + $0x20] sm:$0xff]  ;;  %v1536_v36 = vld [vmem:[#allocation11 + $0x10] sm:$0xff]  ;;  %v1518_v40 = vld [vmem:[#allocation13 + $0x8] sm:$0xff]  ;;  %p2761_p13 = scmp.lt.s32.totalorder %s3284_s23, %s2759_s15  ;;  %p2762_p0 = scmp.lt.s32.totalorder %s2760_s26, %s2754_s21 }
  0xde   : > { %2268 = vmatprep.subr.mxu0 %v2845_v0  ;;  %v1517_v39 = vld [vmem:[#allocation13] sm:$0xff]  ;;  %v1433_v45 = vld [vmem:[#allocation11 + $0x8] sm:$0xff]  ;;  %v1522_v54 = vld [vmem:[#allocation13 + $0x28] sm:$0xff]  ;;  %p2757_p11 = pneg %p2756_p8 }
  0xdf   : > { %v1521_v53 = vld [vmem:[#allocation13 + $0x20] sm:$0xff]  ;;  %v1524_v60 = vld [vmem:[#allocation13 + $0x38] sm:$0xff]  ;;  %v1630_v61 = vld [vmem:[#allocation13 + $0xd0] sm:$0xff]  ;;  %p2763_p1 = por %p2762_p0, %p2761_p13 }
  0xe0   : > { %v2388_v57 = vpack.c.bf16 %v1522_v54, %v1521_v53  ;;  %v1525_v2 = vld [vmem:[#allocation13 + $0x40] sm:$0xff]  ;;  %v1898_v53 = vld [vmem:[#allocation13 + $0x168] sm:$0xff] }
  0xe1   : > { %p2764_p6 = pnand %p2763_p1, %p2757_p11 }
 0x1aa   : > { %v551_v10 = vpop.f32.mrb[0].mxu0  ;;  %v623_v11 = vpop.f32.mrb[0].mxu1 }
 0x1ab   : > { %v772_v12 = vrot.slane %v623_v11, 7  ;;  %v2240_v13 = vpop.f32.mrb[1].mxu0  ;;  %v2245_v14 = vpop.f32.mrb[1].mxu1 }
 0x1ac   : > { %v1352_v13 = vld [vmem:[#allocation10 + $0x58] sm:$0xff] }
 0x1ad   : > { %v781_v15 = vsel %vm780_vm2, %v551_v10, %v772_v12  ;;  %v1347_v10 = vld [vmem:[#allocation10 + $0x30] sm:$0xff]  ;;  %v1350_v12 = vld [vmem:[#allocation10 + $0x48] sm:$0xff] }
 0x1ae   : > { %v695_v16 = vpop.f32.mrb[2].mxu0  ;;  %v767_v17 = vpop.f32.mrb[2].mxu1 }
 0x1af   : > { %v775_v18 = vrot.slane %v695_v16, 6  ;;  %v778_v19 = vrot.slane %v767_v17, 5  ;;  %v2250_v20 = vpop.f32.mrb[3].mxu0  ;;  %v2255_v21 = vpop.f32.mrb[3].mxu1  ;;  %v2346_v16 = vpack.c.bf16 %v1352_v13, %v1350_v12  ;;  %v1349_v17 = vld [vmem:[#allocation10 + $0x40] sm:$0xff]  ;;  %v1635_v12 = vld [vmem:[#allocation13 + $0xf8] sm:$0xff] }
 0x1b0   : > { %v1354_v20 = vld [vmem:[#allocation10 + $0x68] sm:$0xff]  ;;  %v1356_v21 = vld [vmem:[#allocation10 + $0x78] sm:$0xff] }
 0x1b1   : > { %v783_v23 = vsel %vm782_vm3, %v781_v15, %v775_v18  ;;  %v2344_v15 = vpack.c.bf16 %v1347_v10, %v1345_v8  ;;  %v1351_v18 = vld [vmem:[#allocation10 + $0x50] sm:$0xff]  ;;  %v1527_v8 = vld [vmem:[#allocation13 + $0x50] sm:$0xff]  ;;  %v1528_v10 = vld [vmem:[#allocation13 + $0x58] sm:$0xff] }
 0x1b2   : > { %v785_v24 = vsel %vm784_vm4, %v783_v23, %v778_v19  ;;  %v2348_v19 = vpack.c.bf16 %v1351_v18, %v1349_v17  ;;  %v1353_v23 = vld [vmem:[#allocation10 + $0x60] sm:$0xff]  ;;  %v2397_v13 = vpack.c.bf16 %v1528_v10, %v1527_v8  ;;  %v1636_v17 = vld [vmem:[#allocation13 + $0x100] sm:$0xff]  ;;  %v1637_v18 = vld [vmem:[#allocation13 + $0x108] sm:$0xff] }
 0x1b3   : > { %v787_v25 = vadd.f32 %v786_v22, %v785_v24  ;;  %v2350_v22 = vpack.c.bf16 %v1356_v21, %v1354_v20  ;;  %v1355_v24 = vld [vmem:[#allocation10 + $0x70] sm:$0xff]  ;;  %v2376_v20 = vpack.c.bf16 %v1637_v18, %v1636_v17  ;;  %v1531_v21 = vld [vmem:[#allocation13 + $0x70] sm:$0xff] }
 0x1b4   : > { %v2194_v18 = vld [vmem:[%s3338_s10] ss:$0 sm:$0xff] }
 0x1b5   : > { %v788_v26 = vmax.f32 %v787_v25, 0.0  ;;  %v2352_v25 = vpack.c.bf16 %v1355_v24, %v1353_v23  ;;  %v1638_v23 = vld [vmem:[#allocation13 + $0x110] sm:$0xff]  ;;  %v1639_v24 = vld [vmem:[#allocation13 + $0x118] sm:$0xff] }
 0x1b7   : > { %2261 = vmatmul.mubr.msk.f32.vlgmr.msra.gmra.mrb[4].mxu0 %vm791_vm5, %v788_v26 }
 0x1b8   : > { %2270 = vmatprep.mubr.msk.f32.mxu0 %vm2846_vm0, %v2845_v0 }
 0x28a   : > { %v861_v33 = vpop.f32.mrb[4].mxu0 }
 0x28b   : > { %v2262_v37 = vpop.f32.mrb[5].mxu0  ;;  %2264 = vmatpush3.msk.msra.mxu1 %vm870_vm6, %v861_v33  ;;  %2269 = vmatpush3.msk.msra.mxu0 %vm870_vm6, %v861_v33 }
 0x28c   : > { %2266 = vmatmul.mubr.msk.f32.vlgmr.msra.gmra.mrb[4].mxu1 %vm866_vm7, %v865_v31  ;;  %2271 = vmatmul.mubr.msk.f32.vlgmr.msra.gmra.mrb[6].mxu0 %vm866_vm7, %v2171_v32  ;;  %v1622_v32 = vld [vmem:[#allocation13 + $0x90] sm:$0xff] }
 0x28d   : > { %2320 = vmatprep.subr.bf16.mxu1 %v2847_v9  ;;  %2326 = vmatprep.subr.bf16.mxu0 %v2847_v9  ;;  %v1432_v37 = vld [vmem:[#allocation11] sm:$0xff] }
 0x28e   : > { %2322 = vmatpush3.bf16.msra.mxu1 %v2321_v34  ;;  %2328 = vmatpush3.bf16.msra.mxu0 %v2327_v35 }
 0x28f   : > { %2323 = vmatprep.subr.bf16.mxu1 %v2847_v9  ;;  %2329 = vmatprep.subr.bf16.mxu0 %v2847_v9 }
 0x290   : > { %2283 = vmatprep.mubr.msk.f32.mxu1 %vm2846_vm0, %v2845_v0  ;;  %2296 = vmatprep.mubr.msk.f32.mxu0 %vm2846_vm0, %v2845_v0 }
 0x292   : > { %2325 = vmatpush3.bf16.msra.mxu1 %v2324_v41  ;;  %2331 = vmatpush3.bf16.msra.mxu0 %v2330_v42  ;;  %v1624_v41 = vld [vmem:[#allocation13 + $0xa0] sm:$0xff]  ;;  %v1625_v42 = vld [vmem:[#allocation13 + $0xa8] sm:$0xff] }
 0x293   : > { %2281 = vmatprep.subr.mxu1 %v2845_v0  ;;  %2294 = vmatprep.subr.mxu0 %v2845_v0  ;;  %v2358_v46 = vpack.c.bf16 %v1625_v42, %v1624_v41 }
 0x296   : > { %2282 = vmatpush3.msra.mxu1 %v1029_v43  ;;  %2295 = vmatpush3.msra.mxu0 %v948_v44  ;;  %v1537_v43 = vld [vmem:[#allocation11 + $0x18] sm:$0xff]  ;;  %v2382_v44 = vpack.c.bf16 %v1518_v40, %v1517_v39  ;;  %v1891_v39 = vld [vmem:[#allocation13 + $0x130] sm:$0xff]  ;;  %v1892_v40 = vld [vmem:[#allocation13 + $0x138] sm:$0xff] }
 0x297   : > { %2299 = vmatprep.subr.mxu1 %v2845_v0  ;;  %2332 = vmatprep.subr.bf16.mxu0 %v2847_v9 }
 0x35f   : > { %v940_v48 = vpop.f32.mrb[4].mxu1  ;;  %v1020_v49 = vpop.f32.mrb[6].mxu0 }
 0x360   : > { %v2272_v50 = vpop.f32.mrb[7].mxu0  ;;  %2284 = vmatmul.mubr.msk.f32.vlgmr.msra.gmra.mrb[6].mxu1 %vm1030_vm8, %v1020_v49  ;;  %2297 = vmatmul.mubr.msk.f32.vlgmr.msra.gmra.mrb[8].mxu0 %vm1030_vm8, %v940_v48  ;;  %v2267_v51 = vpop.f32.mrb[5].mxu1  ;;  %v1520_v48 = vld [vmem:[#allocation13 + $0x18] sm:$0xff]  ;;  %v1626_v49 = vld [vmem:[#allocation13 + $0xb0] sm:$0xff] }
 0x361   : > { %2300 = vmatpush3.msk.msra.mxu1 %vm870_vm6, %v861_v33  ;;  %2301 = vmatprep.mubr.msk.f32.mxu1 %vm2846_vm0, %v2845_v0  ;;  %v1623_v33 = vld [vmem:[#allocation13 + $0x98] sm:$0xff] }
 0x362   : > { %2334 = vmatpush3.bf16.msra.mxu0 %v2333_v47  ;;  %2314 = vmatprep.mubr.msk.f32.mxu0 %vm2846_vm0, %v2845_v0  ;;  %v2355_v38 = vpack.c.bf16 %v1623_v33, %v1622_v32  ;;  %v1519_v47 = vld [vmem:[#allocation13 + $0x10] sm:$0xff]  ;;  %v1627_v50 = vld [vmem:[#allocation13 + $0xb8] sm:$0xff] }
 0x363   : > { %2335 = vmatprep.subr.bf16.mxu0 %v2847_v9  ;;  %v2385_v51 = vpack.c.bf16 %v1520_v48, %v1519_v47  ;;  %v1895_v48 = vld [vmem:[#allocation13 + $0x150] sm:$0xff] }
 0x364   : > { %2302 = vmatmul.mubr.msk.f32.vlgmr.msra.gmra.mrb[8].mxu1 %vm866_vm7, %v2176_v52  ;;  %v2361_v52 = vpack.c.bf16 %v1627_v50, %v1626_v49  ;;  %v1896_v49 = vld [vmem:[#allocation13 + $0x158] sm:$0xff] }
 0x365   : > { %1608 = vmatprep.mubr.f32.mxu1 %v2845_v0  ;;  %v1804_v50 = vld [vmem:[#allocation11 + $0x28] sm:$0xff] }
 0x366   : > { %2337 = vmatpush3.bf16.msra.mxu0 %v2336_v55  ;;  %v1628_v55 = vld [vmem:[#allocation13 + $0xc0] sm:$0xff] }
 0x367   : > { %2312 = vmatprep.subr.mxu0 %v2845_v0 }
 0x36a   : > { %2313 = vmatpush3.msra.mxu0 %v1257_v56  ;;  %v1629_v56 = vld [vmem:[#allocation13 + $0xc8] sm:$0xff] }
 0x36b   : > { %2339 = vmatprep.subr.bf16.mxu0 %v2338_v59  ;;  %v2364_v58 = vpack.c.bf16 %v1629_v56, %v1628_v55  ;;  %v1523_v59 = vld [vmem:[#allocation13 + $0x30] sm:$0xff]  ;;  %v1900_v56 = vld [vmem:[#allocation13 + $0x178] sm:$0xff] }
 0x36c   : > { %v1899_v55 = vld [vmem:[#allocation13 + $0x170] sm:$0xff] }
 0x433   : > { %v1100_v62 = vpop.f32.mrb[6].mxu1  ;;  %v1173_v63 = vpop.f32.mrb[8].mxu0 }
 0x434   : > { %v1174_v3 = vadd.f32 %v1173_v63, %v1100_v62  ;;  %v2285_v4 = vpop.f32.mrb[7].mxu1  ;;  %v2298_v5 = vpop.f32.mrb[9].mxu0  ;;  %v1631_v62 = vld [vmem:[#allocation13 + $0xd8] sm:$0xff]  ;;  %v2391_v63 = vpack.c.bf16 %v1524_v60, %v1523_v59  ;;  %v1903_v60 = vld [vmem:[#allocation13 + $0x190] sm:$0xff] }
 0x435   : > { %v2367_v1 = vpack.c.bf16 %v1631_v62, %v1630_v61  ;;  %v1632_v4 = vld [vmem:[#allocation13 + $0xe0] sm:$0xff]  ;;  %v1633_v5 = vld [vmem:[#allocation13 + $0xe8] sm:$0xff]  ;;  %v1904_v61 = vld [vmem:[#allocation13 + $0x198] sm:$0xff] }
 0x436   : > { %v2430_v62 = vpack.c.bf16 %v1904_v61, %v1903_v60 }
 0x437   : > { %v1248_v11 = vpop.f32.mrb[8].mxu1 }
 0x438   : > { %v2303_v14 = vpop.f32.mrb[9].mxu1  ;;  %2315 = vmatmul.mubr.msk.f32.vlgmr.msra.gmra.mrb[10].mxu0 %vm1030_vm8, %v1248_v11  ;;  %v1634_v11 = vld [vmem:[#allocation13 + $0xf0] sm:$0xff] }
 0x439   : > { %2341 = vmatpush1.bf16.msra.mxu0 %v2340_v6  ;;  %1425 = vmatprep.mubr.f32.mxu0 %v2845_v0  ;;  %v2373_v14 = vpack.c.bf16 %v1635_v12, %v1634_v11 }
 0x43a   : > { %2343 = vmatprep.subr.bf16.mxu0 %v2342_v7  ;;  %v2370_v7 = vpack.c.bf16 %v1633_v5, %v1632_v4 }
 0x43d   : > { %2345 = vmatpush1.bf16.msra.mxu0 %v2344_v15  ;;  %v1529_v15 = vld [vmem:[#allocation13 + $0x60] sm:$0xff] }
 0x43e   : > { %2347 = vmatprep.subr.bf16.mxu0 %v2346_v16  ;;  %v1530_v16 = vld [vmem:[#allocation13 + $0x68] sm:$0xff] }
 0x441   : > { %2349 = vmatpush1.bf16.msra.mxu0 %v2348_v19  ;;  %v2400_v19 = vpack.c.bf16 %v1530_v16, %v1529_v15 }
 0x442   : > { %2351 = vmatprep.subr.bf16.mxu0 %v2350_v22  ;;  %v1532_v22 = vld [vmem:[#allocation13 + $0x78] sm:$0xff] }
 0x445   : > { %2353 = vmatpush1.bf16.msra.mxu0 %v2352_v25  ;;  %v2403_v25 = vpack.c.bf16 %v1532_v22, %v1531_v21 }
 0x50b   : > { %v1327_v26 = vpop.f32.mrb[10].mxu0 }
 0x50c   : > { %v1331_v28 = vadd.f32 %v1327_v26, %v1174_v3  ;;  %v2316_v29 = vpop.f32.mrb[11].mxu0  ;;  %v1526_v3 = vld [vmem:[#allocation13 + $0x48] sm:$0xff]  ;;  %v2379_v26 = vpack.c.bf16 %v1639_v24, %v1638_v23 }
 0x50d   : > { %v2394_v6 = vpack.c.bf16 %v1526_v3, %v1525_v2 }
 0x50e   : > { %v1339_v30 = vadd.f32 %v2180_v27, %v1331_v28  ;;  %v1533_v27 = vld [vmem:[#allocation13 + $0x80] sm:$0xff]  ;;  %v1534_v28 = vld [vmem:[#allocation13 + $0x88] sm:$0xff] }
 0x50f   : > { %v2406_v29 = vpack.c.bf16 %v1534_v28, %v1533_v27 }
 0x510   : > { %v1340_v31 = vmax.f32 %v1339_v30, 0.0  ;;  %v1889_v30 = vld [vmem:[#allocation13 + $0x120] sm:$0xff] }
 0x512   : > { %2181 = vmatmul.mubr.msk.f32.vlgmr.msra.gmra.mrb[12].mxu0 %vm1357_vm9, %v1340_v31  ;;  %v1890_v31 = vld [vmem:[#allocation13 + $0x128] sm:$0xff] }
 0x513   : > { %1504 = vmatprep.mubr.f32.mxu0 %v2845_v0 }
 0x5e5   : > { %v3220_v34 = vpop.f32.mrb[12].mxu0 }
 0x5e6   : > { %v3222_v35 = vpop.f32.mrb[13].mxu0 }
 0x5e7   : > { %1440 = vmatprep.subr.mxu0 %v3222_v35  ;;  %1544 = vmatprep.subr.mxu1 %v3222_v35 }
 0x5e8   : > { %1441 = vmatpush1.msra.mxu0 %v3220_v34  ;;  %1545 = vmatpush1.msra.mxu1 %v3220_v34 }
 0x5e9   : > { %2184 = vmatmul.mubr.msk.f32.vlgmr.msra.gmra.mrb[10].mxu1 %vm481_vm1, %v1536_v36  ;;  %2354 = vmatprep.subr.bf16.mxu0 %v2847_v9 }
 0x5ea   : > { %2182 = vmatmul.mubr.msk.f32.vlgmr.msra.gmra.mrb[14].mxu0 %vm481_vm1, %v1432_v37  ;;  %1614 = vmatprep.mubr.f32.mxu1 %v2845_v0  ;;  %v2409_v37 = vpack.c.bf16 %v1890_v31, %v1889_v30 }
 0x5eb   : > { %2356 = vmatpush1.bf16.msra.mxu0 %v2355_v38  ;;  %1510 = vmatprep.mubr.f32.mxu0 %v2845_v0 }
 0x5ec   : > { %2357 = vmatprep.subr.bf16.mxu0 %v2847_v9  ;;  %2381 = vmatprep.subr.bf16.mxu1 %v2847_v9 }
 0x5ed   : > { %2185 = vmatmul.mubr.msk.f32.gmra.mrb[12].mxu1 %vm481_vm1, %v1537_v43  ;;  %v2412_v43 = vpack.c.bf16 %v1892_v40, %v1891_v39 }
 0x5ee   : > { %2183 = vmatmul.mubr.msk.f32.gmra.mrb[16].mxu0 %vm481_vm1, %v1433_v45  ;;  %2383 = vmatpush1.bf16.msra.mxu1 %v2382_v44  ;;  %v1893_v45 = vld [vmem:[#allocation13 + $0x140] sm:$0xff] }
 0x5ef   : > { %2359 = vmatpush1.bf16.msra.mxu0 %v2358_v46  ;;  %2384 = vmatprep.subr.bf16.mxu1 %v2847_v9  ;;  %v1894_v46 = vld [vmem:[#allocation13 + $0x148] sm:$0xff] }
 0x5f0   : > { %2360 = vmatprep.subr.bf16.mxu0 %v2847_v9  ;;  %v2415_v47 = vpack.c.bf16 %v1894_v46, %v1893_v45 }
 0x5f2   : > { %2386 = vmatpush1.bf16.msra.mxu1 %v2385_v51  ;;  %v2418_v51 = vpack.c.bf16 %v1896_v49, %v1895_v48 }
 0x5f3   : > { %2362 = vmatpush1.bf16.msra.mxu0 %v2361_v52  ;;  %2387 = vmatprep.subr.bf16.mxu1 %v2847_v9  ;;  %v1897_v52 = vld [vmem:[#allocation13 + $0x160] sm:$0xff] }
 0x5f4   : > { %2363 = vmatprep.subr.bf16.mxu0 %v2847_v9  ;;  %v2421_v54 = vpack.c.bf16 %v1898_v53, %v1897_v52 }
 0x5f6   : > { %2389 = vmatpush1.bf16.msra.mxu1 %v2388_v57  ;;  %v2424_v57 = vpack.c.bf16 %v1900_v56, %v1899_v55 }
 0x5f7   : > { %2365 = vmatpush1.bf16.msra.mxu0 %v2364_v58  ;;  %2390 = vmatprep.subr.bf16.mxu1 %v2847_v9  ;;  %v1902_v58 = vld [vmem:[#allocation13 + $0x188] sm:$0xff] }
 0x5f8   : > { %2366 = vmatprep.subr.bf16.mxu0 %v2847_v9 }
 0x5fa   : > { %2392 = vmatpush1.bf16.msra.mxu1 %v2391_v63  ;;  %v1905_v63 = vld [vmem:[#allocation13 + $0x1a0] sm:$0xff] }
 0x5fb   : > { %2368 = vmatpush1.bf16.msra.mxu0 %v2367_v1  ;;  %2393 = vmatprep.subr.bf16.mxu1 %v2847_v9  ;;  %v1906_v1 = vld [vmem:[#allocation13 + $0x1a8] sm:$0xff] }
 0x5fc   : > { %2369 = vmatprep.subr.bf16.mxu0 %v2847_v9  ;;  %v2433_v2 = vpack.c.bf16 %v1906_v1, %v1905_v63 }
 0x5fe   : > { %2395 = vmatpush1.bf16.msra.mxu1 %v2394_v6 }
 0x5ff   : > { %2371 = vmatpush1.bf16.msra.mxu0 %v2370_v7  ;;  %2396 = vmatprep.subr.bf16.mxu1 %v2847_v9 }
 0x600   : > { %2372 = vmatprep.subr.bf16.mxu0 %v2847_v9 }
 0x602   : > { %2398 = vmatpush1.bf16.msra.mxu1 %v2397_v13 }
 0x603   : > { %2374 = vmatpush1.bf16.msra.mxu0 %v2373_v14  ;;  %2399 = vmatprep.subr.bf16.mxu1 %v2847_v9 }
 0x604   : > { %2375 = vmatprep.subr.bf16.mxu0 %v2847_v9 }
 0x606   : > { %2401 = vmatpush1.bf16.msra.mxu1 %v2400_v19 }
 0x607   : > { %2377 = vmatpush1.bf16.msra.mxu0 %v2376_v20  ;;  %2402 = vmatprep.subr.bf16.mxu1 %v2847_v9 }
 0x608   : > { %2378 = vmatprep.subr.bf16.mxu0 %v2847_v9 }
 0x60a   : > { %2404 = vmatpush1.bf16.msra.mxu1 %v2403_v25 }
 0x60b   : > { %2380 = vmatpush1.bf16.msra.mxu0 %v2379_v26  ;;  %2405 = vmatprep.subr.bf16.mxu1 %v2847_v9 }
 0x60c   : > { %1811 = vmatprep.subr.mxu0 %v3222_v35 }
 0x60e   : > { %2407 = vmatpush1.bf16.msra.mxu1 %v2406_v29 }
 0x60f   : > { %2408 = vmatprep.subr.bf16.mxu1 %v2847_v9 }
 0x6bc   : > { %v1610_v32 = vpop.f32.mrb[10].mxu1 }
 0x6bd   : > { %v1506_v33 = vpop.f32.mrb[14].mxu0  ;;  %v1612_v36 = vpop.f32.mrb[11].mxu1 }
 0x6be   : > { %v1508_v38 = vpop.f32.mrb[15].mxu0  ;;  %2186 = vmatprep.mubr.msk.f32.mxu0 %vm791_vm5, %v1612_v36 }
 0x6bf   : > { %1711 = vmatmul.mubr.f32.vlgmr.msra.gmra.mrb[18].mxu0 %v1610_v32  ;;  %2188 = vmatprep.mubr.msk.f32.mxu1 %vm791_vm5, %v1508_v38 }
 0x6c0   : > { %1812 = vmatpush1.msra.mxu0 %v3220_v34  ;;  %v1616_v35 = vpop.f32.mrb[12].mxu1  ;;  %1792 = vmatmul.mubr.f32.vlgmr.msra.gmra.mrb[14].mxu1 %v1506_v33  ;;  %v1803_v34 = vld [vmem:[#allocation11 + $0x20] sm:$0xff] }
 0x6c1   : > { %v1512_v41 = vpop.f32.mrb[16].mxu0  ;;  %v1618_v42 = vpop.f32.mrb[13].mxu1  ;;  %2410 = vmatpush1.bf16.msra.mxu1 %v2409_v37 }
 0x6c2   : > { %v1514_v44 = vpop.f32.mrb[17].mxu0  ;;  %2187 = vmatprep.mubr.msk.f32.mxu0 %vm791_vm5, %v1618_v42  ;;  %2411 = vmatprep.subr.bf16.mxu1 %v2847_v9 }
 0x6c3   : > { %1716 = vmatmul.mubr.f32.gmra.mrb[20].mxu0 %v1616_v35  ;;  %2189 = vmatprep.mubr.msk.f32.mxu1 %vm791_vm5, %v1514_v44 }
 0x6c4   : > { %1797 = vmatmul.mubr.f32.gmra.mrb[16].mxu1 %v1512_v41  ;;  %1875 = vmatprep.mubr.f32.mxu0 %v2845_v0 }
 0x6c5   : > { %2413 = vmatpush1.bf16.msra.mxu1 %v2412_v43 }
 0x6c6   : > { %2414 = vmatprep.subr.bf16.mxu1 %v2847_v9 }
 0x6c7   : > { %2190 = vmatmul.mubr.msk.f32.vlgmr.msra.gmra.mrb[22].mxu0 %vm481_vm1, %v1803_v34 }
 0x6c8   : > { %1881 = vmatprep.mubr.f32.mxu0 %v2845_v0  ;;  %v1901_v0 = vld [vmem:[#allocation13 + $0x180] sm:$0xff] }
 0x6c9   : > { %2416 = vmatpush1.bf16.msra.mxu1 %v2415_v47  ;;  %v2427_v59 = vpack.c.bf16 %v1902_v58, %v1901_v0 }
 0x6ca   : > { %2417 = vmatprep.subr.bf16.mxu1 %v2847_v9 }
 0x6cb   : > { %2191 = vmatmul.mubr.msk.f32.gmra.mrb[24].mxu0 %vm481_vm1, %v1804_v50 }
 0x6cd   : > { %2419 = vmatpush1.bf16.msra.mxu1 %v2418_v51 }
 0x6ce   : > { %2420 = vmatprep.subr.bf16.mxu1 %v2847_v9 }
 0x6d1   : > { %2422 = vmatpush1.bf16.msra.mxu1 %v2421_v54 }
 0x6d2   : > { %2423 = vmatprep.subr.bf16.mxu1 %v2847_v9 }
 0x6d5   : > { %2425 = vmatpush1.bf16.msra.mxu1 %v2424_v57 }
 0x6d6   : > { %2426 = vmatprep.subr.bf16.mxu1 %v2847_v9 }
 0x6d9   : > { %2428 = vmatpush1.bf16.msra.mxu1 %v2427_v59 }
 0x6da   : > { %2429 = vmatprep.subr.bf16.mxu1 %v2847_v9 }
 0x6dd   : > { %2431 = vmatpush1.bf16.msra.mxu1 %v2430_v62 }
 0x6de   : > { %2432 = vmatprep.subr.bf16.mxu1 %v2847_v9 }
 0x6e1   : > { %2434 = vmatpush1.bf16.msra.mxu1 %v2433_v2 }
 0x792   : > { %v1712_v3 = vpop.f32.mrb[18].mxu0 }
 0x793   : > { %v1714_v4 = vpop.f32.mrb[19].mxu0  ;;  %v1793_v5 = vpop.f32.mrb[14].mxu1 }
 0x794   : > { %v1794_v6 = vadd.f32 %v1793_v5, %v1712_v3  ;;  %v1795_v7 = vpop.f32.mrb[15].mxu1 }
 0x796   : > { %v1717_v8 = vpop.f32.mrb[20].mxu0 }
 0x797   : > { %v1719_v10 = vpop.f32.mrb[21].mxu0  ;;  %v1798_v11 = vpop.f32.mrb[16].mxu1 }
 0x798   : > { %v1799_v12 = vadd.f32 %v1798_v11, %v1717_v8  ;;  %v1800_v13 = vpop.f32.mrb[17].mxu1 }
 0x79a   : > { %v1877_v14 = vpop.f32.mrb[22].mxu0 }
 0x79b   : > { %v1879_v15 = vpop.f32.mrb[23].mxu0 }
 0x79c   : > { %2192 = vmatprep.mubr.msk.f32.mxu1 %vm791_vm5, %v1879_v15 }
 0x79d   : > { %1978 = vmatmul.mubr.f32.vlgmr.msra.gmra.mrb[18].mxu1 %v1877_v14 }
 0x79e   : > { %v1883_v9 = vpop.f32.mrb[24].mxu0 }
 0x79f   : > { %v1885_v16 = vpop.f32.mrb[25].mxu0 }
 0x7a0   : > { %2193 = vmatprep.mubr.msk.f32.mxu1 %vm791_vm5, %v1885_v16 }
 0x7a1   : > { %1983 = vmatmul.mubr.f32.gmra.mrb[20].mxu1 %v1883_v9 }
 0x870   : > { %v1979_v17 = vpop.f32.mrb[18].mxu1 }
 0x871   : > { %v1988_v19 = vadd.f32 %v1979_v17, %v1794_v6  ;;  %v1981_v20 = vpop.f32.mrb[19].mxu1 }
 0x873   : > { %v1997_v21 = vadd.f32 %v2194_v18, %v1988_v19 }
 0x874   : > { %v1984_v22 = vpop.f32.mrb[20].mxu1 }
 0x875   : > { %2554 = vtanh.f32 %v1997_v21  ;;  %v1989_v23 = vadd.f32 %v1984_v22, %v1799_v12  ;;  %v1986_v24 = vpop.f32.mrb[21].mxu1 }
 0x877   : > { %v1998_v25 = vadd.f32 %v2194_v18, %v1989_v23 }
 0x879   : > { %2556 = vtanh.f32 %v1998_v25 }
 0x87f   : > { %v2555_v26 = vpop.eup %2554 }
 0x880   : > { %2001 = vst.msk [vmem:[%s475_s25] sm:$0xff] %vm791_vm5, %v2555_v26 }
 0x883   : > { %v2557_v27 = vpop.eup %2556 }
 0x884   : > { %2002 = vst.msk [vmem:[%s475_s25 + $0x8] sm:$0xff] %vm791_vm5, %v2557_v27 }
 0x885   : > { %2767 = shalt.err (!%p2764_p6)
}
 0x886   : > { %s2768_s30 = scalar_lea.hbm %s3282_s17, 256  ;;  %s2772_s12 = scalar_lea.hbm %s3339_s11, 512 }
 0x887   : > { %p2769_p5 = scmp.ne.s32.totalorder %s3282_s17, %s2768_s30  ;;  %p2773_p10 = scmp.lt.u32.totalorder %s3282_s17, %s3339_s11 }
 0x888   : > { %p2774_p2 = scmp.lt.u32.totalorder %s2772_s12, %s2768_s30  ;;  %p2776_p4 = scmp.lt.u32.totalorder %s2768_s30, %s3282_s17 }
 0x889   : > { %p2770_p9 = pnand %p2769_p5, %p3375_p7 }
 0x88a   : > { %p2775_p3 = por %p2774_p2, %p2773_p10 }
 0x88b   : > { %p2771_p12 = pneg %p2770_p9 }
 0x88c   : > { %p2777_p8 = por %p2776_p4, %p2775_p3 }
 0x88e   : > { %p2778_p11 = pnand %p2777_p8, %p2771_p12 }
 0x890   : > { %2781 = shalt.err (!%p2778_p11)
}
 0x891   : > { %s2849_s20 = smov 128   ;;  %s2850_s2 = smov 8  }
 0x892   : > { %2463 = dma.vmem_to_hbm [thread:$0]  (%p3375_p7), %s3284_s23, 256, %s3282_s17, %s3287_s22, %s2849_s20, %s2849_s20, %s2850_s2  }
 0x893 PF: > { %s3376_s28 = sld [smem:[#allocation22_spill]]  ;;  %s3377_s25 = sld [smem:[#allocation20_spill]] }
 0x894   : > { %s3378_s29 = sld [smem:[#allocation25_spill]] }
 0x899   : > { %p2505_p13 = scmp.ge.s32.totalorder %s3376_s28, 2  ;;  %s2032_s13 = sand.u32 1, %s3377_s25  }
 0x89a   : > { %p3379_p0 = scmp.ne.s32.totalorder %s3378_s29, 0  ;;  %s2033_s21 = scalar_lea.sflag [#allocation4], %s2032_s13 }
 0x89c   : > { %p2488_p1 = pnand %p2505_p13, %p3379_p0 }
 0x89e   : > { %2815 = dma.done.wait (!%p2488_p1), %s2033_s21, 256  }
 0x89f   : > { %2817 = vsyncadd (!%p2488_p1), %s2033_s21, 4294967040  ;;  %s3380_s20 = sld [smem:[#allocation23_spill]]  ;;  %s3381_s5 = sld [smem:[#allocation21_spill]] }
 0x8a0   : > { %s3382_s19 = sld [smem:[#allocation24_spill]]  ;;  %s3383_s17 = smov %s2824_s18 }
 0x8a5   : > { %p25_p6 = scmp.ge.s32.totalorder %s3380_s20, 4   ;;  %s3384_s18 = smov %s3381_s5 }
 0x8a7   :  { %27 = sbr.rel (!%p25_p6) target bundleno = 10 (0xa), region = 139 }
 0x8ae   :  { %2038 = vsyncpa [#allocation3], 1 }
 0x8af   :  { %2040 = vsyncpa [#allocation3 + $0x1], 1 }
 0x8b0   :  { %2041 = vsyncpa [#allocation6], 1 }
 0x8b1   :  { %2042 = vsyncpa [#allocation9], 1 }
 0x8b2   :  { %2043 = vsyncpa [#allocation12], 1 }
 0x8b3   :  { %2044 = vsyncpa [#allocation4], 1 }
 0x8b4   :  { %2046 = vsyncpa [#allocation4 + $0x1], 1 }

</bundles_post_ra>
